<compile_context>
chip_gen: v5e
topology: v5e:2x2
jax: 0.10.0
libtpu: 0.0.40
codegen_flags: <defaults>
</compile_context>

<pallas_src>
import functools

import jax
import jax.numpy as jnp
from jax.experimental import pallas as pl
from jax.experimental.pallas import tpu as pltpu

L2_EPS = 1e-12            # F.normalize default
_LOG_FLT_MAX = 88.72283   # log(float32 max): exp overflow threshold
_LOG_FLT_MIN = -103.2789  # log(smallest float32 subnormal): exp underflow threshold


def _l2norm_kernel(x_ref, o_ref, *, eps):
    """Row-wise L2 normalize along the last dim of a (TN, D) tile."""
    x = x_ref[...].astype(jnp.float32)                       # (TN, D)
    ss = jnp.sum(x * x, axis=-1, keepdims=True)              # (TN, 1)
    # 1 / max(||x||, eps) == rsqrt(max(||x||^2, eps^2)): one EUP op per row.
    inv = jax.lax.rsqrt(jnp.maximum(ss, jnp.float32(eps * eps)))
    o_ref[...] = (x * inv).astype(o_ref.dtype)


def _global_min_kernel(x_ref, o_ref, *, tile_rows, tiles_per_core, n_rows):
    """Accumulate a per-core partial min of x into a (1,1) SMEM scalar block.

    Grid is (ncore, tiles_per_core): leading axis is "parallel" (v7x megacore
    sharding), trailing axis is "arbitrary" (running-min accumulation).
    """
    c = pl.program_id(0)
    i = pl.program_id(1)
    t = c * tiles_per_core + i                                # global tile index
    x = x_ref[...].astype(jnp.float32)
    # Mask rows of overhanging / out-of-range tiles so padding can't win the min.
    rows = jax.lax.broadcasted_iota(jnp.int32, x.shape, 0) + t * tile_rows
    x = jnp.where(rows < n_rows, x, jnp.inf)
    tile_min = jnp.min(x)

    @pl.when(i == 0)
    def _():
        o_ref[0, 0] = tile_min

    @pl.when(i > 0)
    def _():
        o_ref[0, 0] = jnp.minimum(o_ref[0, 0], tile_min)


def _pow_roundtrip_kernel(gamma_ref, x_ref, o_ref, *, ps):
    """out = ((x - gamma)^ps)^(1/ps) + gamma  (mean over the singleton dim is identity).

    Only 2 transcendentals/element: lz = ps*log(y) is computed once and reused for
    both pow's; float32 overflow (-> inf) and underflow (-> 0) of the intermediate
    z = y^ps are reproduced with cheap VPU selects instead of extra EUP ops.
    """
    gamma = gamma_ref[0, 0]
    x = x_ref[...].astype(jnp.float32)
    y = jnp.maximum(x - gamma, 0.0)          # >= 0 by construction of the global min
    tiny = jnp.float32(1e-30)
    lz = jnp.float32(ps) * jnp.log(jnp.maximum(y, tiny))      # log of z = y**ps
    r = jnp.exp(lz * jnp.float32(1.0 / ps))                   # z**(1/ps) == y (rounded)
    r = jnp.where(y > 0, r, 0.0)                              # exact 0 stays 0
    r = jnp.where(lz < jnp.float32(_LOG_FLT_MIN), 0.0, r)     # z underflow -> 0
    r = jnp.where(lz > jnp.float32(_LOG_FLT_MAX), jnp.float32(jnp.inf), r)  # overflow
    o_ref[...] = (r + gamma).astype(o_ref.dtype)


def _vmem_params():
    """Device-derived (tile_footprint_budget, scoped_vmem_limit) in bytes."""
    cap = 128 << 20
    try:
        info = pltpu.get_tpu_info()
        cap = int(getattr(info, "vmem_capacity_bytes", cap)) or cap
    except Exception:
        pass
    budget = min(24 << 20, max(8 << 20, cap // 3))   # total pipeline footprint target
    limit = min(32 << 20, max(16 << 20, cap // 2))   # explicit scoped-VMEM limit
    return budget, limit


def _row_tile(n_rows, d, itemsize, vmem_budget_bytes):
    """Rows per grid tile: whole array if it fits, else a dtype-aligned multiple."""
    sub = max(8, 32 // max(1, itemsize))      # f32: 8, bf16: 16, int8/fp8: 32 sublanes
    per_row = max(1, d * itemsize * 4)        # in + out, double-buffered
    t = vmem_budget_bytes // per_row
    if t >= n_rows:
        return n_rows                         # single tile: full dims are always legal
    # TODO(synk): for extremely large d even `sub` rows may exceed the budget; a
    # feature-dim split would be needed in that regime.
    return max(sub, (t // sub) * sub)


def _elementwise_view(n, d):
    """Lane-dense (rows, width) view for the purely elementwise / global-min passes."""
    if d % 128 == 0:
        return n, d
    total = n * d
    if total % 128 != 0:
        return n, d  # TODO(synk): padded path for fully ragged feature dims
    for w in (1024, 896, 768, 640, 512, 384, 256, 128):
        if total % w == 0:
            return total // w, w
    return n, d


def sgem_forward(x, ps=10.0, infinity=True, eps=L2_EPS, *, row_tile=None):
    """Pallas implementation of sgem.forward. x: any shape; normalize dim is the last."""
    orig_shape = x.shape
    d = orig_shape[-1]
    x2 = x.reshape(-1, d)                     # collapse leading dims (layout no-op)
    n = x2.shape[0]
    budget, limit = _vmem_params()
    itemsize = x2.dtype.itemsize

    if infinity:
        tn = row_tile or _row_tile(n, d, itemsize, budget)
        grid = (pl.cdiv(n, tn),)
        row_spec = pl.BlockSpec((tn, d), lambda i: (i, 0))
        out = pl.pallas_call(
            functools.partial(_l2norm_kernel, eps=float(eps)),
            out_shape=jax.ShapeDtypeStruct((n, d), x2.dtype),
            grid=grid,
            in_specs=[row_spec],
            out_specs=row_spec,
            compiler_params=pltpu.CompilerParams(
                dimension_semantics=("parallel",), vmem_limit_bytes=limit),
            cost_estimate=pl.CostEstimate(
                flops=3 * n * d, transcendentals=n,
                bytes_accessed=2 * n * d * itemsize),
        )(x2)
        return out.reshape(orig_shape)

    # ---- infinity=False: global-min shift + elementwise pow round-trip ----
    # Re-block to a lane-dense view (no per-row structure in these passes).
    ne, de = _elementwise_view(n, d)
    xe = x2.reshape(ne, de)
    tne = row_tile or _row_tile(ne, de, itemsize, budget)
    n_tiles = pl.cdiv(ne, tne)

    # Pass 1: global minimum. 2-D grid ("parallel", "arbitrary"): on v7x each
    # TensorCore scans half the tiles into its own SMEM partial; combined below.
    ncore = 2 if n_tiles >= 2 else 1
    tiles_per_core = pl.cdiv(n_tiles, ncore)
    min_in_spec = pl.BlockSpec(
        (tne, de),
        lambda c, i: (jnp.minimum(c * tiles_per_core + i, n_tiles - 1), 0))
    min_out_spec = pl.BlockSpec((1, 1), lambda c, i: (c, 0),
                                memory_space=pltpu.MemorySpace.SMEM)
    partial_mins = pl.pallas_call(
        functools.partial(_global_min_kernel, tile_rows=tne,
                          tiles_per_core=tiles_per_core, n_rows=ne),
        out_shape=jax.ShapeDtypeStruct((ncore, 1), jnp.float32),
        grid=(ncore, tiles_per_core),
        in_specs=[min_in_spec],
        out_specs=min_out_spec,
        compiler_params=pltpu.CompilerParams(
            dimension_semantics=("parallel", "arbitrary"),
            vmem_limit_bytes=limit),
        cost_estimate=pl.CostEstimate(
            flops=ne * de, transcendentals=0,
            bytes_accessed=ne * de * itemsize),
    )(xe)
    gamma = jnp.min(partial_mins).reshape(1, 1)   # combine per-core partials (scalar)

    # Pass 2: tiled elementwise pow round-trip, gamma read from SMEM each step.
    # TODO(synk): sweep pipeline_mode=pl.Buffered(3) on row_spec if xprof shows
    # exposed DMA for very small per-step tiles.
    row_spec = pl.BlockSpec((tne, de), lambda i: (i, 0))
    smem_scalar_spec = pl.BlockSpec((1, 1), lambda i: (0, 0),
                                    memory_space=pltpu.MemorySpace.SMEM)
    out = pl.pallas_call(
        functools.partial(_pow_roundtrip_kernel, ps=float(ps)),
        out_shape=jax.ShapeDtypeStruct((ne, de), xe.dtype),
        grid=(n_tiles,),
        in_specs=[smem_scalar_spec, row_spec],
        out_specs=row_spec,
        compiler_params=pltpu.CompilerParams(
            dimension_semantics=("parallel",), vmem_limit_bytes=limit),
        cost_estimate=pl.CostEstimate(
            flops=6 * ne * de, transcendentals=2 * ne * de,
            bytes_accessed=2 * ne * de * itemsize),
    )(gamma, xe)
    return out.reshape(orig_shape)


if __name__ == "__main__":
    key = jax.random.PRNGKey(0)
    # Small descriptor-like stack: (batch=2, seq=16, feature=128); normalize dim = last.
    x = jax.random.normal(key, (2, 16, 128), dtype=jnp.float32)

    # --- infinity=True (default): L2 normalize along the last dim ---
    out = jax.block_until_ready(sgem_forward(x, ps=10.0, infinity=True))
    ref = x / jnp.maximum(jnp.linalg.norm(x, axis=-1, keepdims=True), L2_EPS)
    assert out.shape == x.shape, out.shape
    assert bool(jnp.all(jnp.isfinite(out)))
    assert bool(jnp.allclose(out, ref, rtol=1e-3, atol=1e-4)), \
        float(jnp.max(jnp.abs(out - ref)))

    # --- infinity=False: global-min shift + pow round-trip ---
    out2 = jax.block_until_ready(sgem_forward(x, ps=10.0, infinity=False))
    gamma = jnp.min(x)
    ref2 = ((x - gamma) ** 10.0) ** (1.0 / 10.0) + gamma
    assert out2.shape == x.shape, out2.shape
    assert bool(jnp.all(jnp.isfinite(out2)))
    assert bool(jnp.allclose(out2, ref2, rtol=1e-3, atol=1e-3)), \
        float(jnp.max(jnp.abs(out2 - ref2)))

    # --- forced multi-tile path: exercises the 2-D ("parallel","arbitrary") min grid ---
    out3 = jax.block_until_ready(sgem_forward(x, ps=10.0, infinity=False, row_tile=8))
    assert bool(jnp.allclose(out3, ref2, rtol=1e-3, atol=1e-3)), \
        float(jnp.max(jnp.abs(out3 - ref2)))
    out4 = jax.block_until_ready(sgem_forward(x, ps=10.0, infinity=True, row_tile=8))
    assert bool(jnp.allclose(out4, ref, rtol=1e-3, atol=1e-4)), \
        float(jnp.max(jnp.abs(out4 - ref)))

    # --- feature dim not a multiple of 128: exercises the lane-dense re-blocked view ---
    y = jax.random.normal(jax.random.PRNGKey(1), (2, 16, 96), dtype=jnp.float32)
    outy = jax.block_until_ready(sgem_forward(y, ps=10.0, infinity=False))
    gy = jnp.min(y)
    refy = ((y - gy) ** 10.0) ** (1.0 / 10.0) + gy
    assert outy.shape == y.shape, outy.shape
    assert bool(jnp.allclose(outy, refy, rtol=1e-3, atol=1e-3)), \
        float(jnp.max(jnp.abs(outy - refy)))

    print("KERNEL_OK")
</pallas_src>

<mosaic_0001>
module attributes {stable_mosaic.version = 11 : i64} {
  func.func @_l2norm_kernel(%arg0: i32, %arg1: memref<32x128xf32, #tpu.memory_space<vmem>>, %arg2: memref<32x128xf32, #tpu.memory_space<vmem>>) attributes {dimension_semantics = [#tpu.dimension_semantics<parallel>], iteration_bounds = array<i64: 1>, scalar_prefetch = 0 : i64, scratch_operands = 0 : i64, tpu.core_type = #tpu.core_type<tc>, window_params = [{transform_indices = @transform_0, window_bounds = array<i64: 32, 128>}, {transform_indices = @transform_1, window_bounds = array<i64: 32, 128>}]} {
    %c0 = arith.constant 0 : index
    %c0_0 = arith.constant 0 : index
    %0 = vector.load %arg1[%c0, %c0_0] : memref<32x128xf32, #tpu.memory_space<vmem>>, vector<32x128xf32>
    %1 = arith.mulf %0, %0 : vector<32x128xf32>
    %cst = arith.constant dense<0.000000e+00> : vector<32xf32>
    %2 = vector.multi_reduction <add>, %1, %cst [1] : vector<32x128xf32> to vector<32xf32>
    %3 = vector.shape_cast %2 : vector<32xf32> to vector<32x1xf32>
    %cst_1 = arith.constant 1.000000e-24 : f32
    %4 = vector.broadcast %cst_1 : f32 to vector<32x1xf32>
    %5 = arith.maximumf %3, %4 : vector<32x1xf32>
    %6 = math.rsqrt %5 : vector<32x1xf32>
    %7 = vector.broadcast %6 : vector<32x1xf32> to vector<32x128xf32>
    %8 = arith.mulf %0, %7 : vector<32x128xf32>
    %c0_2 = arith.constant 0 : index
    %c0_3 = arith.constant 0 : index
    %9 = vector.load %arg2[%c0_2, %c0_3] : memref<32x128xf32, #tpu.memory_space<vmem>>, vector<32x128xf32>
    tpu.vector_store %arg2[%c0_2, %c0_3], %8 {strides = array<i32>} : memref<32x128xf32, #tpu.memory_space<vmem>>, vector<32x128xf32>,
    return
  }
  func.func @transform_0(%arg0: i32) -> (i32, i32) {
    %c0_i32 = arith.constant 0 : i32
    %c0_i32_0 = arith.constant 0 : i32
    return %arg0, %c0_i32 : i32, i32
  }
  func.func @transform_1(%arg0: i32) -> (i32, i32) {
    %c0_i32 = arith.constant 0 : i32
    %c0_i32_0 = arith.constant 0 : i32
    return %arg0, %c0_i32 : i32, i32
  }
}

</mosaic_0001>

<bundles_post_ra>
// kernel: tpu_custom_call.1
= control target key start
LH: loop header
LB: loop body
LE: loop exit
PB: predicated region body
PF: predicated region fallthrough
CT: control target
= control target key end

     0   :  { %6 = vsyncpa [#allocation3], 0  ;;  %s212_s0 = inlined_call_operand.hbm [shape: f32[32,128], index: 0, kind: input, shape index: {}]   ;;  %s213_s1 = inlined_call_operand.hbm [shape: f32[32,128], index: 1, kind: output, shape index: {}]  }
   0x1   :  { %7 = vsyncpa [#allocation4], 0  ;;  %s12_s8 = sshll.u32 %s212_s0, 4  ;;  %s176_s9 = smov [#allocation2]   ;;  %s13_s8 = int_to_ptr.hbm [resolvable:$true] %s12_s8 }
   0x2   :  { %s14_s10 = sshll.u32 %s176_s9, 4  ;;  %s177_s11 = smov 128   ;;  %s15_s10 = int_to_ptr.vmem [resolvable:$true] %s14_s10 }
   0x3   :  { %s178_s12 = smov 8  }
   0x4   :  { %20 = dma.hbm_to_vmem [thread:$0]  %s13_s8, 512, %s15_s10, [#allocation3], %s177_s11, %s177_s11, %s178_s12  }
   0x5   :  { %172 = dma.done.wait [#allocation3], 512  }
   0x6   :  { %173 = vsyncadd [#allocation3], 4294966784  ;;  %v27_v0 = vld [vmem:[#allocation2 + $0x10] sm:$0xff]  ;;  %v25_v1 = vld [vmem:[#allocation2] sm:$0xff]  ;;  %s179_s0 = smov [#allocation5]   ;;  %s99_s16 = sshll.u32 %s213_s1, 4  ;;  %s100_s16 = int_to_ptr.hbm [resolvable:$true] %s99_s16 }
   0x7   :  { %v31_v2 = vmul.f32 %v27_v0, %v27_v0  ;;  %v29_v3 = vmul.f32 %v25_v1, %v25_v1  ;;  %v196_v4 = vld [vmem:[#allocation2 + $0x18] sm:$0xff]  ;;  %v198_v5 = vld [vmem:[#allocation2 + $0x8] sm:$0xff]  ;;  %s97_s13 = sshll.u32 %s179_s0, 4  ;;  %s98_s13 = int_to_ptr.vmem [resolvable:$true] %s97_s13 }
   0x8   :  { %v32_v6 = vmul.f32 %v196_v4, %v196_v4  ;;  %v30_v7 = vmul.f32 %v198_v5, %v198_v5 }
   0x9   :  { %37 = vadd.xlane.f32.xlu1 %v31_v2  ;;  %33 = vadd.xlane.f32.xlu0 %v29_v3 }
  0x11   :  { %39 = vadd.xlane.f32.xlu1 %v32_v6  ;;  %35 = vadd.xlane.f32.xlu0 %v30_v7 }
  0x7c   :  { %v38_v8 = vpop.xlane.xlu1 %37  ;;  %v34_v9 = vpop.xlane.xlu0 %33 }
  0x7d   :  { %v43_v10 = vmax.f32 %v38_v8, 1e-24  ;;  %v41_v11 = vmax.f32 %v34_v9, 1e-24 }
  0x7f   :  { %116 = vrsqrt.f32 %v43_v10  ;;  %vm71_vm2 = vweird.f32 %v43_v10  ;;  %vm51_vm4 = vweird.f32 %v41_v11 }
  0x80   :  { %118 = vrsqrt.f32 %v41_v11 }
  0x84   :  { %v40_v12 = vpop.xlane.xlu1 %39  ;;  %v36_v13 = vpop.xlane.xlu0 %35 }
  0x85   :  { %v117_v14 = vpop.eup %116  ;;  %v44_v15 = vmax.f32 %v40_v12, 1e-24  ;;  %v42_v16 = vmax.f32 %v36_v13, 1e-24 }
  0x86   :  { %v119_v17 = vpop.eup %118  ;;  %v66_v18 = vmul.f32 %v117_v14, %v43_v10  ;;  %vm72_vm0 = vweird.f32 %v117_v14 }
  0x87   :  { %v46_v19 = vmul.f32 %v119_v17, %v41_v11  ;;  %120 = vrsqrt.f32 %v44_v15  ;;  %vm52_vm1 = vweird.f32 %v119_v17  ;;  %vm73_vm3 = vmor %vm71_vm2, %vm72_vm0  ;;  %vm81_vm8 = vweird.f32 %v44_v15 }
  0x88   :  { %v67_v20 = vmul.f32 %v117_v14, %v66_v18  ;;  %122 = vrsqrt.f32 %v42_v16  ;;  %vm53_vm5 = vmor %vm51_vm4, %vm52_vm1  ;;  %vm61_vm10 = vweird.f32 %v42_v16 }
  0x89   :  { %v47_v21 = vmul.f32 %v119_v17, %v46_v19 }
  0x8a   :  { %v68_v22 = vmul.f32 0.5, %v67_v20 }
  0x8b   :  { %v48_v23 = vmul.f32 0.5, %v47_v21 }
  0x8c   :  { %v69_v24 = vsub.f32 1.5, %v68_v22 }
  0x8d   :  { %v121_v25 = vpop.eup %120  ;;  %v49_v26 = vsub.f32 1.5, %v48_v23 }
  0x8e   :  { %v123_v27 = vpop.eup %122  ;;  %v70_v28 = vmul.f32 %v117_v14, %v69_v24  ;;  %v76_v29 = vmul.f32 %v121_v25, %v44_v15  ;;  %vm82_vm6 = vweird.f32 %v121_v25 }
  0x8f   :  { %v50_v30 = vmul.f32 %v119_v17, %v49_v26  ;;  %v56_v31 = vmul.f32 %v123_v27, %v42_v16  ;;  %vm62_vm7 = vweird.f32 %v123_v27  ;;  %vm83_vm9 = vmor %vm81_vm8, %vm82_vm6 }
  0x90   :  { %v74_v32 = vsel %vm73_vm3, %v117_v14, %v70_v28  ;;  %v77_v33 = vmul.f32 %v121_v25, %v76_v29  ;;  %vm63_vm11 = vmor %vm61_vm10, %vm62_vm7 }
  0x91   :  { %v87_v34 = vmul.f32 %v74_v32, %v27_v0  ;;  %v54_v35 = vsel %vm53_vm5, %v119_v17, %v50_v30  ;;  %v57_v36 = vmul.f32 %v123_v27, %v56_v31 }
  0x92   :  { %v85_v37 = vmul.f32 %v54_v35, %v25_v1  ;;  %v78_v38 = vmul.f32 0.5, %v77_v33 }
  0x93   :  { %91 = vst [vmem:[#allocation5 + $0x10] sm:$0xff] %v87_v34  ;;  %v58_v39 = vmul.f32 0.5, %v57_v36 }
  0x94   :  { %89 = vst [vmem:[#allocation5] sm:$0xff] %v85_v37  ;;  %v79_v40 = vsub.f32 1.5, %v78_v38 }
  0x95   :  { %v59_v41 = vsub.f32 1.5, %v58_v39 }
  0x96   :  { %v80_v42 = vmul.f32 %v121_v25, %v79_v40 }
  0x97   :  { %v60_v43 = vmul.f32 %v123_v27, %v59_v41 }
  0x98   :  { %v84_v44 = vsel %vm83_vm9, %v121_v25, %v80_v42 }
  0x99   :  { %v88_v45 = vmul.f32 %v84_v44, %v196_v4  ;;  %v64_v46 = vsel %vm63_vm11, %v123_v27, %v60_v43 }
  0x9a   :  { %v86_v47 = vmul.f32 %v64_v46, %v198_v5 }
  0x9b   :  { %92 = vst [vmem:[#allocation5 + $0x18] sm:$0xff] %v88_v45 }
  0x9c   :  { %90 = vst [vmem:[#allocation5 + $0x8] sm:$0xff] %v86_v47 }
  0x9d   :  { %105 = dma.vmem_to_hbm [thread:$0]  %s98_s13, 512, %s100_s16, [#allocation4], %s177_s11, %s177_s11, %s178_s12  }
  0x9e   :  { %174 = dma.done.wait [#allocation4], 512  }
  0x9f   :  { %175 = vsyncadd [#allocation4], 4294966784 }
  0xa0   :  { %110 = vsyncpa [#allocation3], 1 }
  0xa1   :  { %111 = vsyncpa [#allocation4], 1 }

</bundles_post_ra>
